<compile_context>
chip_gen: v5e
topology: v5e:2x2
jax: 0.10.0
libtpu: 0.0.40
codegen_flags: <defaults>
</compile_context>

<pallas_src>
import functools

import jax
import jax.numpy as jnp
from jax.experimental import pallas as pl
from jax.experimental.pallas import tpu as pltpu


def _round_up(x, m):
    return ((x + m - 1) // m) * m


# --------------------------------------------------------------------------
# Pallas kernel: one RGCNConv layer (relation reduction folded into K)
# --------------------------------------------------------------------------
def rgcn_kernel(x_ref, a_ref, xw_ref, root_ref, b_ref, o_ref, acc_ref,
                *, apply_relu):
    k = pl.program_id(1)

    # Init accumulator with the root (self) transform + bias on the first
    # K step of this row tile.
    @pl.when(k == 0)
    def _():
        acc_ref[...] = (
            jnp.dot(x_ref[...], root_ref[...],
                    preferred_element_type=jnp.float32)
            + b_ref[...]
        )

    # Hot loop: one MXU matmul per (row-tile, K-tile) step.
    # A_flat tile [tm, tk] @ stacked-XW tile [tk, C].
    acc_ref[...] += jnp.dot(a_ref[...], xw_ref[...],
                            preferred_element_type=jnp.float32)

    # Finalize (optionally fuse the ReLU of GCN.forward).
    @pl.when(k == pl.num_programs(1) - 1)
    def _():
        res = acc_ref[...]
        if apply_relu:
            res = jnp.maximum(res, 0.0)
        o_ref[...] = res.astype(o_ref.dtype)


def rgcn_conv(x, adj, weight, root, bias, *, apply_relu=False,
              tm_max=512, tk_max=1024):
    """One RGCNConv layer via pallas_call.

    x:      [N, c_in]   float32
    adj:    [R, N, N]   float32 (mean-normalized dense adjacency, per relation)
    weight: [R, c_in, c_out]
    root:   [c_in, c_out]
    bias:   [1, c_out]
    returns [N, c_out]
    """
    num_relations, n, _ = adj.shape
    c_in = x.shape[1]
    c_out = weight.shape[2]

    # Lane-dense output width.
    c_pad = max(128, _round_up(c_out, 128))

    # Row / K tiling (padded so the grid divides evenly; zero padding keeps
    # the reduction exact and padded rows are sliced off at the end).
    tm = min(tm_max, _round_up(n, 8))
    n_pad = _round_up(n, tm)
    k_raw = num_relations * n_pad
    tk = min(tk_max, _round_up(k_raw, 128))
    k_pad = _round_up(k_raw, tk)

    # Zero-pad parameters along the output-feature lane axis.
    w_pad = jnp.zeros((num_relations, c_in, c_pad),
                      jnp.float32).at[:, :, :c_out].set(weight)
    root_pad = jnp.zeros((c_in, c_pad), jnp.float32).at[:, :c_out].set(root)
    bias_pad = jnp.zeros((1, c_pad), jnp.float32).at[:, :c_out].set(bias)

    # Small pre-transform (done once, outside the N^2 hot loop):
    # XW[r] = X @ W_r, stacked over (relation, source node) -> one K axis.
    xw = jnp.einsum('nc,rcd->rnd', x, w_pad,
                    preferred_element_type=jnp.float32)        # [R, N, C]
    xw = jnp.pad(xw, ((0, 0), (0, n_pad - n), (0, 0)))
    xw = xw.reshape(num_relations * n_pad, c_pad)
    xw = jnp.pad(xw, ((0, k_pad - k_raw), (0, 0)))             # [Kp, C]

    # Flatten adjacency over (relation, source node) to match the stacked XW.
    a_flat = jnp.pad(adj, ((0, 0), (0, n_pad - n), (0, n_pad - n)))
    a_flat = a_flat.transpose(1, 0, 2).reshape(n_pad, num_relations * n_pad)
    a_flat = jnp.pad(a_flat, ((0, 0), (0, k_pad - k_raw)))     # [Np, Kp]

    x_pad = jnp.pad(x, ((0, n_pad - n), (0, 0)))               # [Np, c_in]

    kernel = functools.partial(rgcn_kernel, apply_relu=apply_relu)

    flops = 2 * n_pad * k_pad * c_pad + 2 * n_pad * c_in * c_pad
    bytes_accessed = 4 * (n_pad * k_pad + k_pad * c_pad + n_pad * c_in
                          + c_in * c_pad + c_pad + n_pad * c_pad)
    cost = pl.CostEstimate(flops=flops, transcendentals=0,
                           bytes_accessed=bytes_accessed)

    grid_spec = pltpu.PrefetchScalarGridSpec(
        num_scalar_prefetch=0,
        grid=(n_pad // tm, k_pad // tk),
        in_specs=[
            pl.BlockSpec((tm, c_in), lambda i, k: (i, 0)),     # X (root term)
            pl.BlockSpec((tm, tk), lambda i, k: (i, k)),       # A_flat tile
            pl.BlockSpec((tk, c_pad), lambda i, k: (k, 0)),    # stacked XW
            pl.BlockSpec((c_in, c_pad), lambda i, k: (0, 0)),  # W_root
            pl.BlockSpec((1, c_pad), lambda i, k: (0, 0)),     # bias
        ],
        out_specs=pl.BlockSpec((tm, c_pad), lambda i, k: (i, 0)),
        scratch_shapes=[pltpu.VMEM((tm, c_pad), jnp.float32)],
    )

    out = pl.pallas_call(
        kernel,
        grid_spec=grid_spec,
        out_shape=jax.ShapeDtypeStruct((n_pad, c_pad), jnp.float32),
        compiler_params=pltpu.CompilerParams(
            dimension_semantics=("parallel", "arbitrary"),
            vmem_limit_bytes=32 * 1024 * 1024,
        ),
        cost_estimate=cost,
    )(x_pad, a_flat, xw, root_pad, bias_pad)

    return out[:n, :c_out]


# --------------------------------------------------------------------------
# Plain-JAX glue
# --------------------------------------------------------------------------
def build_normalized_adjacency(edge_index, edge_type, num_nodes,
                               num_relations):
    """Dense, per-relation, mean-normalized adjacency: A[r,i,j]=1/deg_r(i)."""
    src = edge_index[0]
    dst = edge_index[1]
    adj = jnp.zeros((num_relations, num_nodes, num_nodes), jnp.float32)
    adj = adj.at[edge_type, dst, src].add(1.0)
    deg = jnp.sum(adj, axis=2, keepdims=True)
    adj = adj / jnp.maximum(deg, 1.0)
    return adj


def glorot(key, shape):
    fan_in, fan_out = shape[-2], shape[-1]
    limit = jnp.sqrt(6.0 / (fan_in + fan_out))
    return jax.random.uniform(key, shape, jnp.float32, -limit, limit)


def init_gcn_params(key, c_in=3, c_out=2, num_relations=3):
    k1, k2, k3, k4 = jax.random.split(key, 4)
    params = {
        "conv1": {
            "weight": glorot(k1, (num_relations, c_in, c_out)),
            "root": glorot(k2, (c_in, c_out)),
            "bias": jnp.zeros((1, c_out), jnp.float32),
        },
        "conv2": {
            "weight": glorot(k3, (num_relations, c_out, c_out)),
            "root": glorot(k4, (c_out, c_out)),
            "bias": jnp.zeros((1, c_out), jnp.float32),
        },
    }
    return params


def gcn_forward(params, x, edge_index, edge_attr, *, num_relations=3):
    n = x.shape[0]
    adj = build_normalized_adjacency(edge_index, edge_attr, n, num_relations)

    # conv1 + relu (fused in kernel)
    h = rgcn_conv(x, adj, params["conv1"]["weight"], params["conv1"]["root"],
                  params["conv1"]["bias"], apply_relu=True)
    # TODO(synk): F.dropout is identity at inference; training-mode dropout
    # (p=0.5) not implemented here.
    # conv2
    out = rgcn_conv(h, adj, params["conv2"]["weight"],
                    params["conv2"]["root"], params["conv2"]["bias"],
                    apply_relu=False)
    return out


# --------------------------------------------------------------------------
# Pure-JAX reference (for a sanity check)
# --------------------------------------------------------------------------
def rgcn_ref(x, adj, weight, root, bias):
    out = x @ root + bias
    for r in range(adj.shape[0]):
        out = out + (adj[r] @ x) @ weight[r]
    return out


def gcn_ref(params, x, edge_index, edge_attr, num_relations=3):
    n = x.shape[0]
    adj = build_normalized_adjacency(edge_index, edge_attr, n, num_relations)
    h = jnp.maximum(
        rgcn_ref(x, adj, params["conv1"]["weight"], params["conv1"]["root"],
                 params["conv1"]["bias"]), 0.0)
    return rgcn_ref(h, adj, params["conv2"]["weight"],
                    params["conv2"]["root"], params["conv2"]["bias"])


# --------------------------------------------------------------------------
if __name__ == "__main__":
    key = jax.random.PRNGKey(0)
    k_param, k_x, k_src, k_dst, k_type = jax.random.split(key, 5)

    num_nodes = 8
    num_edges = 16
    c_in, c_out, num_relations = 3, 2, 3

    x = jax.random.normal(k_x, (num_nodes, c_in), jnp.float32)
    edge_index = jnp.stack([
        jax.random.randint(k_src, (num_edges,), 0, num_nodes),
        jax.random.randint(k_dst, (num_edges,), 0, num_nodes),
    ])                                                    # [2, E]
    edge_attr = jax.random.randint(k_type, (num_edges,), 0, num_relations)

    params = init_gcn_params(k_param, c_in, c_out, num_relations)

    out = gcn_forward(params, x, edge_index, edge_attr,
                      num_relations=num_relations)
    out = jax.block_until_ready(out)

    ref = gcn_ref(params, x, edge_index, edge_attr, num_relations)
    assert out.shape == (num_nodes, c_out)
    assert jnp.allclose(out, ref, atol=1e-4, rtol=1e-4), (out, ref)

    print("KERNEL_OK")
</pallas_src>

<mosaic_0001>
module attributes {stable_mosaic.version = 11 : i64} {
  func.func @rgcn_kernel(%arg0: i32, %arg1: i32, %arg2: memref<8x3xf32, #tpu.memory_space<vmem>>, %arg3: memref<8x128xf32, #tpu.memory_space<vmem>>, %arg4: memref<128x128xf32, #tpu.memory_space<vmem>>, %arg5: memref<3x128xf32, #tpu.memory_space<vmem>>, %arg6: memref<1x128xf32, #tpu.memory_space<vmem>>, %arg7: memref<8x128xf32, #tpu.memory_space<vmem>>, %arg8: memref<8x128xf32, #tpu.memory_space<vmem>>) attributes {dimension_semantics = [#tpu.dimension_semantics<parallel>, #tpu.dimension_semantics<arbitrary>], iteration_bounds = array<i64: 1, 1>, scalar_prefetch = 0 : i64, scratch_operands = 1 : i64, tpu.core_type = #tpu.core_type<tc>, window_params = [{transform_indices = @transform_0, window_bounds = array<i64: 8, 3>}, {transform_indices = @transform_1, window_bounds = array<i64: 8, 128>}, {transform_indices = @transform_2, window_bounds = array<i64: 128, 128>}, {pipeline_mode = #tpu.pipeline_mode<synchronous>, transform_indices = @transform_3, window_bounds = array<i64: 3, 128>}, {pipeline_mode = #tpu.pipeline_mode<synchronous>, transform_indices = @transform_4, window_bounds = array<i64: 1, 128>}, {transform_indices = @transform_5, window_bounds = array<i64: 8, 128>}]} {
    %c0_i32 = arith.constant 0 : i32
    %0 = arith.cmpi eq, %arg1, %c0_i32 : i32
    %1 = arith.extui %0 : i1 to i32
    %c0_i32_0 = arith.constant 0 : i32
    %2 = arith.cmpi ne, %1, %c0_i32_0 : i32
    scf.if %2 {
      %c0_10 = arith.constant 0 : index
      %c0_11 = arith.constant 0 : index
      %12 = vector.load %arg2[%c0_10, %c0_11] : memref<8x3xf32, #tpu.memory_space<vmem>>, vector<8x3xf32>
      %c0_12 = arith.constant 0 : index
      %c0_13 = arith.constant 0 : index
      %13 = vector.load %arg5[%c0_12, %c0_13] : memref<3x128xf32, #tpu.memory_space<vmem>>, vector<3x128xf32>
      %cst_14 = arith.constant dense<0.000000e+00> : vector<8x128xf32>
      %14 = tpu.matmul %12, %13, %cst_14 {dimension_numbers = #tpu.dot_dimension_numbers<[1], [0], [0], [1], [0, 0, 1, 1], [], []>} : vector<8x3xf32>, vector<3x128xf32>, vector<8x128xf32> -> vector<8x128xf32>
      %c0_15 = arith.constant 0 : index
      %c0_16 = arith.constant 0 : index
      %15 = vector.load %arg6[%c0_15, %c0_16] : memref<1x128xf32, #tpu.memory_space<vmem>>, vector<1x128xf32>
      %16 = vector.broadcast %15 : vector<1x128xf32> to vector<8x128xf32>
      %17 = arith.addf %14, %16 : vector<8x128xf32>
      %c0_17 = arith.constant 0 : index
      %c0_18 = arith.constant 0 : index
      %18 = vector.load %arg8[%c0_17, %c0_18] : memref<8x128xf32, #tpu.memory_space<vmem>>, vector<8x128xf32>
      tpu.vector_store %arg8[%c0_17, %c0_18], %17 {strides = array<i32>} : memref<8x128xf32, #tpu.memory_space<vmem>>, vector<8x128xf32>,
    } else {
    }
    %c0 = arith.constant 0 : index
    %c0_1 = arith.constant 0 : index
    %3 = vector.load %arg8[%c0, %c0_1] : memref<8x128xf32, #tpu.memory_space<vmem>>, vector<8x128xf32>
    %c0_2 = arith.constant 0 : index
    %c0_3 = arith.constant 0 : index
    %4 = vector.load %arg3[%c0_2, %c0_3] : memref<8x128xf32, #tpu.memory_space<vmem>>, vector<8x128xf32>
    %c0_4 = arith.constant 0 : index
    %c0_5 = arith.constant 0 : index
    %5 = vector.load %arg4[%c0_4, %c0_5] : memref<128x128xf32, #tpu.memory_space<vmem>>, vector<128x128xf32>
    %cst = arith.constant dense<0.000000e+00> : vector<8x128xf32>
    %6 = tpu.matmul %4, %5, %cst {dimension_numbers = #tpu.dot_dimension_numbers<[1], [0], [0], [1], [0, 0, 1, 1], [], []>} : vector<8x128xf32>, vector<128x128xf32>, vector<8x128xf32> -> vector<8x128xf32>
    %7 = arith.addf %3, %6 : vector<8x128xf32>
    %c0_6 = arith.constant 0 : index
    %c0_7 = arith.constant 0 : index
    %8 = vector.load %arg8[%c0_6, %c0_7] : memref<8x128xf32, #tpu.memory_space<vmem>>, vector<8x128xf32>
    tpu.vector_store %arg8[%c0_6, %c0_7], %7 {strides = array<i32>} : memref<8x128xf32, #tpu.memory_space<vmem>>, vector<8x128xf32>,
    %c0_i32_8 = arith.constant 0 : i32
    %9 = arith.cmpi eq, %arg1, %c0_i32_8 : i32
    %10 = arith.extui %9 : i1 to i32
    %c0_i32_9 = arith.constant 0 : i32
    %11 = arith.cmpi ne, %10, %c0_i32_9 : i32
    scf.if %11 {
      %c0_10 = arith.constant 0 : index
      %c0_11 = arith.constant 0 : index
      %12 = vector.load %arg8[%c0_10, %c0_11] : memref<8x128xf32, #tpu.memory_space<vmem>>, vector<8x128xf32>
      %cst_12 = arith.constant 0.000000e+00 : f32
      %13 = vector.broadcast %cst_12 : f32 to vector<8x128xf32>
      %14 = arith.maximumf %12, %13 : vector<8x128xf32>
      %c0_13 = arith.constant 0 : index
      %c0_14 = arith.constant 0 : index
      %15 = vector.load %arg7[%c0_13, %c0_14] : memref<8x128xf32, #tpu.memory_space<vmem>>, vector<8x128xf32>
      tpu.vector_store %arg7[%c0_13, %c0_14], %14 {strides = array<i32>} : memref<8x128xf32, #tpu.memory_space<vmem>>, vector<8x128xf32>,
    } else {
    }
    return
  }
  func.func @transform_0(%arg0: i32, %arg1: i32) -> (i32, i32) {
    %c0_i32 = arith.constant 0 : i32
    %c0_i32_0 = arith.constant 0 : i32
    return %arg0, %c0_i32 : i32, i32
  }
  func.func @transform_1(%arg0: i32, %arg1: i32) -> (i32, i32) {
    %c0_i32 = arith.constant 0 : i32
    return %arg0, %arg1 : i32, i32
  }
  func.func @transform_2(%arg0: i32, %arg1: i32) -> (i32, i32) {
    %c0_i32 = arith.constant 0 : i32
    %c0_i32_0 = arith.constant 0 : i32
    return %arg1, %c0_i32 : i32, i32
  }
  func.func @transform_3(%arg0: i32, %arg1: i32) -> (i32, i32) {
    %c0_i32 = arith.constant 0 : i32
    %c0_i32_0 = arith.constant 0 : i32
    %c0_i32_1 = arith.constant 0 : i32
    return %c0_i32, %c0_i32_0 : i32, i32
  }
  func.func @transform_4(%arg0: i32, %arg1: i32) -> (i32, i32) {
    %c0_i32 = arith.constant 0 : i32
    %c0_i32_0 = arith.constant 0 : i32
    %c0_i32_1 = arith.constant 0 : i32
    return %c0_i32, %c0_i32_0 : i32, i32
  }
  func.func @transform_5(%arg0: i32, %arg1: i32) -> (i32, i32) {
    %c0_i32 = arith.constant 0 : i32
    %c0_i32_0 = arith.constant 0 : i32
    return %arg0, %c0_i32 : i32, i32
  }
}

</mosaic_0001>

<bundles_post_ra>
// kernel: tpu_custom_call.1
= control target key start
LH: loop header
LB: loop body
LE: loop exit
PB: predicated region body
PF: predicated region fallthrough
CT: control target
= control target key end

     0   :  { %10 = vsyncpa [#allocation4], 0  ;;  %s250_s0 = inlined_call_operand.vmem [shape: f32[8,3], index: 0, kind: input, shape index: {}]   ;;  %s251_s1 = inlined_call_operand.vmem [shape: f32[8,128], index: 1, kind: input, shape index: {}]   ;;  %s252_s2 = inlined_call_operand.hbm [shape: f32[128,128], index: 2, kind: input, shape index: {}]   ;;  %s253_s3 = inlined_call_operand.vmem [shape: f32[3,128], index: 3, kind: input, shape index: {}]   ;;  %s254_s4 = inlined_call_operand.vmem [shape: f32[1,128], index: 4, kind: input, shape index: {}]   ;;  %s255_s5 = inlined_call_operand.hbm [shape: f32[8,128], index: 5, kind: output, shape index: {}]  }
   0x1   :  { %11 = vsyncpa [#allocation5], 0  ;;  %s20_s20 = sshll.u32 %s252_s2, 4  ;;  %s198_s21 = smov [#allocation3]   ;;  %s21_s20 = int_to_ptr.hbm [resolvable:$true] %s20_s20 }
   0x2   :  { %s22_s22 = sshll.u32 %s198_s21, 4  ;;  %s199_s23 = smov 128   ;;  %s23_s22 = int_to_ptr.vmem [resolvable:$true] %s22_s22 }
   0x3   :  { %s200_s24 = smov 8  }
   0x4   :  { %28 = dma.hbm_to_vmem [thread:$0]  %s21_s20, 2048, %s23_s22, [#allocation4], %s199_s23, %s199_s23, %s200_s24  }
   0x5   :  { %194 = dma.done.wait [#allocation4], 2048  }
   0x6   :  { %195 = vsyncadd [#allocation4], 4294965248  ;;  %v93_v0 = vld [vmem:[#allocation3 + $0x78] sm:$0xff]  ;;  %v92_v1 = vld [vmem:[#allocation3 + $0x70] sm:$0xff]  ;;  %vm51_vm0 = vcmask 1042432   ;;  %vm47_vm1 = vcmask 23552  }
   0x7   :  { %94 = vmatpush.msra.mxu1 %v93_v0  ;;  %v91_v2 = vld [vmem:[#allocation3 + $0x68] sm:$0xff]  ;;  %v90_v3 = vld [vmem:[#allocation3 + $0x60] sm:$0xff]  ;;  %v89_v6 = vld [vmem:[#allocation3 + $0x58] sm:$0xff]  ;;  %s201_s30 = smov [#allocation6]   ;;  %s129_s9 = sshll.u32 %s255_s5, 4  ;;  %s130_s9 = int_to_ptr.hbm [resolvable:$true] %s129_s9 }
   0x8   :  { %v42_v4 = vld [vmem:[%s253_s3] sm:$0x7]  ;;  %v88_v7 = vld [vmem:[#allocation3 + $0x50] sm:$0xff]  ;;  %v87_v8 = vld [vmem:[#allocation3 + $0x48] sm:$0xff]  ;;  %s127_s6 = sshll.u32 %s201_s30, 4  ;;  %s128_s6 = int_to_ptr.vmem [resolvable:$true] %s127_s6 }
   0x9   :  { %95 = vmatpush.msra.mxu1 %v92_v1  ;;  %139 = vmatpush.msk.msra.mxu0 %vm51_vm0, %v42_v4  ;;  %v41_v5 = vld [vmem:[%s250_s0] sm:$0xff]  ;;  %v85_v10 = vld [vmem:[#allocation3 + $0x38] sm:$0xff]  ;;  %v84_v11 = vld [vmem:[#allocation3 + $0x30] sm:$0xff] }
   0xa   :  { %140 = vmatmul.msk.f32.vlgmr.msra.gmra.mxu0 %vm47_vm1, %v41_v5  ;;  %v86_v9 = vld [vmem:[#allocation3 + $0x40] sm:$0xff]  ;;  %v83_v12 = vld [vmem:[#allocation3 + $0x28] sm:$0xff]  ;;  %v81_v14 = vld [vmem:[#allocation3 + $0x18] sm:$0xff] }
   0xb   :  { %96 = vmatpush.msra.mxu1 %v91_v2  ;;  %v82_v13 = vld [vmem:[#allocation3 + $0x20] sm:$0xff]  ;;  %v80_v15 = vld [vmem:[#allocation3 + $0x10] sm:$0xff]  ;;  %v79_v16 = vld [vmem:[#allocation3 + $0x8] sm:$0xff] }
   0xc   :  { %v78_v17 = vld [vmem:[#allocation3] sm:$0xff] }
   0xd   :  { %97 = vmatpush.msra.mxu1 %v90_v3  ;;  %v77_v18 = vld [vmem:[%s251_s1] sm:$0xff] }
   0xe   :  { %v145_v19 = vld [vmem:[%s254_s4] ss:$0 sm:$0xff] }
   0xf   :  { %98 = vmatpush.msra.mxu1 %v89_v6 }
  0x11   :  { %99 = vmatpush.msra.mxu1 %v88_v7 }
  0x13   :  { %100 = vmatpush.msra.mxu1 %v87_v8 }
  0x15   :  { %101 = vmatpush.msra.mxu1 %v86_v9 }
  0x17   :  { %102 = vmatpush.msra.mxu1 %v85_v10 }
  0x19   :  { %103 = vmatpush.msra.mxu1 %v84_v11 }
  0x1b   :  { %104 = vmatpush.msra.mxu1 %v83_v12 }
  0x1d   :  { %105 = vmatpush.msra.mxu1 %v82_v13 }
  0x1f   :  { %106 = vmatpush.msra.mxu1 %v81_v14 }
  0x21   :  { %107 = vmatpush.msra.mxu1 %v80_v15 }
  0x23   :  { %108 = vmatpush.msra.mxu1 %v79_v16 }
  0x25   :  { %109 = vmatpush.msra.mxu1 %v78_v17 }
  0x26   :  { %110 = vmatmul.f32.vlgmr.msra.gmra.mxu1 %v77_v18 }
  0x87   :  { %v72_v20 = vpop.f32.mrf.mxu0 }
  0x88   :  { %v73_v21 = vadd.f32 %v145_v19, %v72_v20 }
  0xa3   :  { %v111_v22 = vpop.f32.mrf.mxu1 }
  0xa4   :  { %v114_v23 = vadd.f32 %v111_v22, %v73_v21 }
  0xa6   :  { %v120_v24 = vmax.f32 %v114_v23, 0.0 }
  0xa8   :  { %121 = vst [vmem:[#allocation6] sm:$0xff] %v120_v24 }
  0xa9   :  { %132 = dma.vmem_to_hbm [thread:$0]  %s128_s6, 128, %s130_s9, [#allocation5]  }
  0xaa   :  { %196 = dma.done.wait [#allocation5], 128  }
  0xab   :  { %197 = vsyncadd [#allocation5], 4294967168 }
  0xac   :  { %137 = vsyncpa [#allocation4], 1 }
  0xad   :  { %138 = vsyncpa [#allocation5], 1 }

</bundles_post_ra>
